<compile_context>
chip_gen: v6e
topology: v6e:2x2x1
jax: 0.10.0
libtpu: 0.0.40
codegen_flags: <defaults>
</compile_context>

<pallas_src>
import functools

import jax
import jax.numpy as jnp
from jax.experimental import pallas as pl
from jax.experimental.pallas import tpu as pltpu


def _round_up(x, m):
    return ((x + m - 1) // m) * m


def _vmem_capacity_bytes():
    try:
        return int(pltpu.get_tpu_info().vmem_capacity_bytes)
    except Exception:
        return 64 * 1024 * 1024   # conservative fallback (v7x per-TC VMEM)


# ----------------------------------------------------------------------------
# Pallas kernel: grid = (batch chunks [parallel], time chunks [serial])
# One grid step integrates TC timesteps for one (TB, Np) batch slab.
# ----------------------------------------------------------------------------
def _mrnn_chunk_kernel(
    w_t_ref,      # (Np, Np)       t_const * W_eff^T (resident), f32 or bf16
    hn0_ref,      # (TB, Np)       initial hidden state for this batch slab
    xn0_ref,      # (TB, Np)       initial pre-activation for this batch slab
    ext_ref,      # (TC, TB, Np)   t_const * external drive, time-major chunk
    out_ref,      # (TC, TB, Np)   hidden states for this chunk, time-major
    xn_scr,       # VMEM (TB, Np)  carried pre-activation state
    hn_scr,       # VMEM (TB, Np)  carried hidden state
    *,
    decay,        # 1 - t_const
    time_chunk,
):
    c = pl.program_id(1)   # time-chunk index (innermost, serial recurrence)

    @pl.when(c == 0)
    def _init():
        xn_scr[...] = xn0_ref[...]
        hn_scr[...] = hn0_ref[...]

    xn = xn_scr[...]
    hn = hn_scr[...]
    w_t = w_t_ref[...]                     # (Np, Np) = t_const * W_eff^T

    # Fully unrolled inner time loop: per-step loads/stores are dense (TB, Np)
    # 2-D slabs (lane-dense, sublane-aligned); xn/hn stay in registers.
    for tc in range(time_chunk):
        rec = jnp.dot(hn.astype(w_t.dtype), w_t,
                      preferred_element_type=jnp.float32)          # (TB, Np)
        xn = decay * xn + rec + ext_ref[tc, :, :]
        hn = jnp.maximum(xn, 0.0)
        out_ref[tc, :, :] = hn.astype(out_ref.dtype)

    xn_scr[...] = xn
    hn_scr[...] = hn


# ----------------------------------------------------------------------------
# Wrapper: hoisted weight prep + time-major external-drive precompute + padding
# ----------------------------------------------------------------------------
def mrnn_forward_pallas(inp, cue_inp, hn, xn, inhib_stim,
                        W_rec, W_mask, W_sign, inp_weights,
                        tonic_inp, thal_mask, *,
                        t_const=0.1, time_chunk=16, batch_chunk=None,
                        weight_dtype=jnp.float32):
    """
    inp:         (B, T, inp_dim)
    cue_inp:     (B, T, N)
    hn, xn:      (1, B, N)
    inhib_stim:  (B, T, N)
    W_rec/W_mask/W_sign: (N, N)
    inp_weights: (n_striatum, inp_dim)
    tonic_inp:   (N,)
    thal_mask:   (N,)
    returns:     (B, T, N)  stacked ReLU hidden states
    """
    B, T, _ = inp.shape
    N = W_rec.shape[0]
    n_str = inp_weights.shape[0]
    f32 = jnp.float32
    t = float(t_const)

    # --- hoisted Dale's-law weight prep (one fused XLA op, not per step) ---
    W_eff = (W_mask.astype(f32) * jnp.clip(W_rec.astype(f32), 0.0, 1.0)
             * W_sign.astype(f32))                                 # (N, N)
    iw_eff = jnp.clip(inp_weights.astype(f32), 0.0, 1.0)           # (n_str, inp_dim)

    # --- time-major external drive, pre-scaled by t_const (folded) ---
    # iti[t, b, :] = (iw_eff @ inp[b, t].T).T  (zero-padded to N below)
    iti = jnp.einsum('bti,si->tbs', inp.astype(f32), iw_eff,
                     precision=jax.lax.Precision.HIGH)             # (T, B, n_str)
    ext = (jnp.swapaxes(inhib_stim.astype(f32), 0, 1)
           + jnp.swapaxes(cue_inp.astype(f32), 0, 1)
           * thal_mask.astype(f32)[None, None, :]
           + tonic_inp.astype(f32)[None, None, :])                 # (T, B, N)
    ext = ext.at[:, :, :n_str].add(iti)
    ext = ext * t

    # --- padding: lane-dense N, sublane-aligned batch, chunked time ---
    Np = max(128, _round_up(N, 128))
    Bp = max(8, _round_up(B, 8))
    if batch_chunk is None:
        # Split batch into 2 parallel chunks when large enough (v7x: 2 TCs).
        batch_chunk = Bp if Bp <= 8 else -(-Bp // 2)
    TB = max(8, _round_up(min(batch_chunk, Bp), 8))
    Bp = _round_up(Bp, TB)
    TC = _round_up(min(time_chunk, T), 8)
    Tp = _round_up(T, TC)
    nb = Bp // TB
    nc = Tp // TC

    # Padded, time-major, t-scaled drive built in one fused op.
    ext_p = jnp.zeros((Tp, Bp, Np), f32).at[:T, :B, :N].set(ext)
    w_t_p = (jnp.zeros((Np, Np), f32).at[:N, :N].set(t * W_eff.T)
             .astype(weight_dtype))
    hn0 = jnp.zeros((Bp, Np), f32).at[:B, :N].set(
        jnp.squeeze(hn, axis=0).astype(f32))
    xn0 = jnp.zeros((Bp, Np), f32).at[:B, :N].set(
        jnp.squeeze(xn, axis=0).astype(f32))

    # --- explicit VMEM budget, clamped to physical capacity (v7x: 64 MiB) ---
    wbytes = jnp.dtype(weight_dtype).itemsize
    est = (2 * Np * Np * wbytes          # resident weight (double-buffered)
           + 2 * 2 * TB * Np * 4         # hn0 / xn0 blocks
           + 2 * 2 * TC * TB * Np * 4    # ext + out chunk streams, 2-deep
           + 2 * TB * Np * 4)            # xn/hn carries
    cap = max(32 * 1024 * 1024, _vmem_capacity_bytes() - 8 * 1024 * 1024)
    vmem_limit = int(min(max(2 * est, 32 * 1024 * 1024), cap))

    kernel = functools.partial(_mrnn_chunk_kernel,
                               decay=1.0 - t, time_chunk=TC)

    out_p = pl.pallas_call(
        kernel,
        out_shape=jax.ShapeDtypeStruct((Tp, Bp, Np), f32),
        grid_spec=pltpu.PrefetchScalarGridSpec(
            num_scalar_prefetch=0,
            grid=(nb, nc),
            in_specs=[
                pl.BlockSpec((Np, Np), lambda b, c: (0, 0)),        # t*W_eff^T
                pl.BlockSpec((TB, Np), lambda b, c: (b, 0)),        # hn0 slab
                pl.BlockSpec((TB, Np), lambda b, c: (b, 0)),        # xn0 slab
                pl.BlockSpec((TC, TB, Np), lambda b, c: (c, b, 0)), # ext chunk
            ],
            out_specs=pl.BlockSpec((TC, TB, Np), lambda b, c: (c, b, 0)),
            scratch_shapes=[
                pltpu.VMEM((TB, Np), f32),   # xn carry
                pltpu.VMEM((TB, Np), f32),   # hn carry
            ],
        ),
        compiler_params=pltpu.CompilerParams(
            dimension_semantics=("parallel", "arbitrary"),
            vmem_limit_bytes=vmem_limit),
    )(w_t_p, hn0, xn0, ext_p)

    # NOTE: padded trailing timesteps are integrated with zero drive; the
    # carried xn/hn in scratch are not returned, only the sliced outputs.
    return jnp.swapaxes(out_p[:T, :B, :N], 0, 1)


# ----------------------------------------------------------------------------
# Pure-JAX reference (mirrors the PyTorch forward, noise=False)
# ----------------------------------------------------------------------------
def mrnn_reference(inp, cue_inp, hn, xn, inhib_stim,
                   W_rec, W_mask, W_sign, inp_weights,
                   tonic_inp, thal_mask, *, t_const=0.1):
    B, T, _ = inp.shape
    N = W_rec.shape[0]
    n_str = inp_weights.shape[0]
    W_eff = W_mask * jnp.clip(W_rec, 0.0, 1.0) * W_sign
    iw_eff = jnp.clip(inp_weights, 0.0, 1.0)

    def step(carry, xs):
        xn_c, hn_c = carry
        inp_tt, cue_tt, stim_tt = xs
        iti_act = (iw_eff @ inp_tt.T).T
        iti = jnp.concatenate(
            [iti_act, jnp.zeros((B, N - n_str), jnp.float32)], axis=-1)
        xn_c = xn_c + t_const * (-xn_c + hn_c @ W_eff.T + iti + tonic_inp
                                 + stim_tt + cue_tt * thal_mask)
        hn_c = jax.nn.relu(xn_c)
        return (xn_c, hn_c), hn_c

    xs = (jnp.swapaxes(inp, 0, 1), jnp.swapaxes(cue_inp, 0, 1),
          jnp.swapaxes(inhib_stim, 0, 1))
    _, hs = jax.lax.scan(step, (jnp.squeeze(xn, 0), jnp.squeeze(hn, 0)), xs)
    return jnp.swapaxes(hs, 0, 1)


# ----------------------------------------------------------------------------
# Deterministic synthetic "config": striatum(16) + thal(16), 2 connections
# ----------------------------------------------------------------------------
if __name__ == "__main__":
    B, T, inp_dim = 2, 8, 4
    n_str, n_thal = 16, 16
    N = n_str + n_thal
    t_const = 0.1

    key = jax.random.PRNGKey(0)
    ks = jax.random.split(key, 8)

    # Region order: [striatum, thal].  W_rec[i, j] = weight j -> i.
    w_thal_to_str = jax.random.uniform(ks[0], (n_str, n_thal), jnp.float32, 0.0, 0.01)
    w_str_to_thal = jax.random.uniform(ks[1], (n_thal, n_str), jnp.float32, 0.0, 0.01)

    W_rec = jnp.zeros((N, N), jnp.float32)
    W_rec = W_rec.at[:n_str, n_str:].set(w_thal_to_str)
    W_rec = W_rec.at[n_str:, :n_str].set(w_str_to_thal)

    W_mask = jnp.zeros((N, N), jnp.float32)
    W_mask = W_mask.at[:n_str, n_str:].set(1.0)
    W_mask = W_mask.at[n_str:, :n_str].set(1.0)

    W_sign = jnp.zeros((N, N), jnp.float32)
    W_sign = W_sign.at[:n_str, n_str:].set(1.0)    # excitatory (thal -> striatum)
    W_sign = W_sign.at[n_str:, :n_str].set(-1.0)   # inhibitory (striatum -> thal)

    inp_weights = jax.random.uniform(ks[2], (n_str, inp_dim), jnp.float32, 0.0, 0.01)

    tonic_inp = jnp.concatenate([
        0.1 * jnp.ones((n_str,), jnp.float32),
        0.2 * jnp.ones((n_thal,), jnp.float32),
    ])
    thal_mask = jnp.concatenate([
        jnp.zeros((n_str,), jnp.float32), jnp.ones((n_thal,), jnp.float32)])

    inp = jax.random.uniform(ks[3], (B, T, inp_dim), jnp.float32)
    cue_inp = jax.random.uniform(ks[4], (B, T, N), jnp.float32)
    inhib_stim = 0.1 * jax.random.normal(ks[5], (B, T, N), jnp.float32)
    hn = jax.nn.relu(jax.random.normal(ks[6], (1, B, N), jnp.float32))
    xn = jax.random.normal(ks[7], (1, B, N), jnp.float32)

    ref = mrnn_reference(inp, cue_inp, hn, xn, inhib_stim,
                         W_rec, W_mask, W_sign, inp_weights,
                         tonic_inp, thal_mask, t_const=t_const)
    ref = jax.block_until_ready(ref)

    # f32 recurrent weight: tight check
    out_f32 = mrnn_forward_pallas(inp, cue_inp, hn, xn, inhib_stim,
                                  W_rec, W_mask, W_sign, inp_weights,
                                  tonic_inp, thal_mask, t_const=t_const,
                                  weight_dtype=jnp.float32)
    out_f32 = jax.block_until_ready(out_f32)
    assert out_f32.shape == (B, T, N), out_f32.shape
    assert jnp.allclose(out_f32, ref, rtol=1e-4, atol=1e-4), (
        float(jnp.max(jnp.abs(out_f32 - ref))))

    # bf16 recurrent weight (MXU-native fast path): drift-tolerant check.
    # TODO(synk): recurrent bf16 rounding drift grows with T; validate on
    # realistic sequence lengths before making bf16 the default.
    out_bf16 = mrnn_forward_pallas(inp, cue_inp, hn, xn, inhib_stim,
                                   W_rec, W_mask, W_sign, inp_weights,
                                   tonic_inp, thal_mask, t_const=t_const,
                                   weight_dtype=jnp.bfloat16)
    out_bf16 = jax.block_until_ready(out_bf16)
    assert jnp.allclose(out_bf16, ref, rtol=1e-2, atol=1e-2), (
        float(jnp.max(jnp.abs(out_bf16 - ref))))

    print("KERNEL_OK")
</pallas_src>

<mosaic_0001>
module attributes {stable_mosaic.version = 11 : i64} {
  func.func @_mrnn_chunk_kernel(%arg0: i32, %arg1: i32, %arg2: memref<128x128xf32, #tpu.memory_space<vmem>>, %arg3: memref<8x128xf32, #tpu.memory_space<vmem>>, %arg4: memref<8x128xf32, #tpu.memory_space<vmem>>, %arg5: memref<8x8x128xf32, #tpu.memory_space<vmem>>, %arg6: memref<8x8x128xf32, #tpu.memory_space<vmem>>, %arg7: memref<8x128xf32, #tpu.memory_space<vmem>>, %arg8: memref<8x128xf32, #tpu.memory_space<vmem>>) attributes {dimension_semantics = [#tpu.dimension_semantics<parallel>, #tpu.dimension_semantics<arbitrary>], iteration_bounds = array<i64: 1, 1>, scalar_prefetch = 0 : i64, scratch_operands = 2 : i64, tpu.core_type = #tpu.core_type<tc>, window_params = [{pipeline_mode = #tpu.pipeline_mode<synchronous>, transform_indices = @transform_0, window_bounds = array<i64: 128, 128>}, {transform_indices = @transform_1, window_bounds = array<i64: 8, 128>}, {transform_indices = @transform_2, window_bounds = array<i64: 8, 128>}, {transform_indices = @transform_3, window_bounds = array<i64: 8, 8, 128>}, {transform_indices = @transform_4, window_bounds = array<i64: 8, 8, 128>}]} {
    %c0_i32 = arith.constant 0 : i32
    %0 = arith.cmpi eq, %arg1, %c0_i32 : i32
    %1 = arith.extui %0 : i1 to i32
    %c0_i32_0 = arith.constant 0 : i32
    %2 = arith.cmpi ne, %1, %c0_i32_0 : i32
    scf.if %2 {
      %c0_74 = arith.constant 0 : index
      %c0_75 = arith.constant 0 : index
      %104 = vector.load %arg4[%c0_74, %c0_75] : memref<8x128xf32, #tpu.memory_space<vmem>>, vector<8x128xf32>
      %c0_76 = arith.constant 0 : index
      %c0_77 = arith.constant 0 : index
      %105 = vector.load %arg7[%c0_76, %c0_77] : memref<8x128xf32, #tpu.memory_space<vmem>>, vector<8x128xf32>
      tpu.vector_store %arg7[%c0_76, %c0_77], %104 {strides = array<i32>} : memref<8x128xf32, #tpu.memory_space<vmem>>, vector<8x128xf32>,
      %c0_78 = arith.constant 0 : index
      %c0_79 = arith.constant 0 : index
      %106 = vector.load %arg3[%c0_78, %c0_79] : memref<8x128xf32, #tpu.memory_space<vmem>>, vector<8x128xf32>
      %c0_80 = arith.constant 0 : index
      %c0_81 = arith.constant 0 : index
      %107 = vector.load %arg8[%c0_80, %c0_81] : memref<8x128xf32, #tpu.memory_space<vmem>>, vector<8x128xf32>
      tpu.vector_store %arg8[%c0_80, %c0_81], %106 {strides = array<i32>} : memref<8x128xf32, #tpu.memory_space<vmem>>, vector<8x128xf32>,
    } else {
    }
    %c0 = arith.constant 0 : index
    %c0_1 = arith.constant 0 : index
    %3 = vector.load %arg7[%c0, %c0_1] : memref<8x128xf32, #tpu.memory_space<vmem>>, vector<8x128xf32>
    %c0_2 = arith.constant 0 : index
    %c0_3 = arith.constant 0 : index
    %4 = vector.load %arg8[%c0_2, %c0_3] : memref<8x128xf32, #tpu.memory_space<vmem>>, vector<8x128xf32>
    %c0_4 = arith.constant 0 : index
    %c0_5 = arith.constant 0 : index
    %5 = vector.load %arg2[%c0_4, %c0_5] : memref<128x128xf32, #tpu.memory_space<vmem>>, vector<128x128xf32>
    %cst = arith.constant dense<0.000000e+00> : vector<8x128xf32>
    %6 = tpu.matmul %4, %5, %cst {dimension_numbers = #tpu.dot_dimension_numbers<[1], [0], [0], [1], [0, 0, 1, 1], [], []>} : vector<8x128xf32>, vector<128x128xf32>, vector<8x128xf32> -> vector<8x128xf32>
    %cst_6 = arith.constant 0.899999976 : f32
    %7 = vector.broadcast %cst_6 : f32 to vector<8x128xf32>
    %8 = arith.mulf %7, %3 : vector<8x128xf32>
    %9 = arith.addf %8, %6 : vector<8x128xf32>
    %c0_7 = arith.constant 0 : index
    %c0_8 = arith.constant 0 : index
    %c0_9 = arith.constant 0 : index
    %10 = vector.load %arg5[%c0_7, %c0_8, %c0_9] : memref<8x8x128xf32, #tpu.memory_space<vmem>>, vector<1x8x128xf32>
    %11 = vector.shape_cast %10 : vector<1x8x128xf32> to vector<8x128xf32>
    %12 = arith.addf %9, %11 : vector<8x128xf32>
    %cst_10 = arith.constant 0.000000e+00 : f32
    %13 = vector.broadcast %cst_10 : f32 to vector<8x128xf32>
    %14 = arith.maximumf %12, %13 : vector<8x128xf32>
    %c0_11 = arith.constant 0 : index
    %c0_12 = arith.constant 0 : index
    %c0_13 = arith.constant 0 : index
    %15 = vector.load %arg6[%c0_11, %c0_12, %c0_13] : memref<8x8x128xf32, #tpu.memory_space<vmem>>, vector<1x8x128xf32>
    %16 = vector.shape_cast %15 : vector<1x8x128xf32> to vector<8x128xf32>
    %17 = vector.shape_cast %14 : vector<8x128xf32> to vector<1x8x128xf32>
    tpu.vector_store %arg6[%c0_11, %c0_12, %c0_13], %17 {strides = array<i32>} : memref<8x8x128xf32, #tpu.memory_space<vmem>>, vector<1x8x128xf32>,
    %cst_14 = arith.constant dense<0.000000e+00> : vector<8x128xf32>
    %18 = tpu.matmul %14, %5, %cst_14 {dimension_numbers = #tpu.dot_dimension_numbers<[1], [0], [0], [1], [0, 0, 1, 1], [], []>} : vector<8x128xf32>, vector<128x128xf32>, vector<8x128xf32> -> vector<8x128xf32>
    %cst_15 = arith.constant 0.899999976 : f32
    %19 = vector.broadcast %cst_15 : f32 to vector<8x128xf32>
    %20 = arith.mulf %19, %12 : vector<8x128xf32>
    %21 = arith.addf %20, %18 : vector<8x128xf32>
    %c1 = arith.constant 1 : index
    %c0_16 = arith.constant 0 : index
    %c0_17 = arith.constant 0 : index
    %22 = vector.load %arg5[%c1, %c0_16, %c0_17] : memref<8x8x128xf32, #tpu.memory_space<vmem>>, vector<1x8x128xf32>
    %23 = vector.shape_cast %22 : vector<1x8x128xf32> to vector<8x128xf32>
    %24 = arith.addf %21, %23 : vector<8x128xf32>
    %cst_18 = arith.constant 0.000000e+00 : f32
    %25 = vector.broadcast %cst_18 : f32 to vector<8x128xf32>
    %26 = arith.maximumf %24, %25 : vector<8x128xf32>
    %c1_19 = arith.constant 1 : index
    %c0_20 = arith.constant 0 : index
    %c0_21 = arith.constant 0 : index
    %27 = vector.load %arg6[%c1_19, %c0_20, %c0_21] : memref<8x8x128xf32, #tpu.memory_space<vmem>>, vector<1x8x128xf32>
    %28 = vector.shape_cast %27 : vector<1x8x128xf32> to vector<8x128xf32>
    %29 = vector.shape_cast %26 : vector<8x128xf32> to vector<1x8x128xf32>
    tpu.vector_store %arg6[%c1_19, %c0_20, %c0_21], %29 {strides = array<i32>} : memref<8x8x128xf32, #tpu.memory_space<vmem>>, vector<1x8x128xf32>,
    %cst_22 = arith.constant dense<0.000000e+00> : vector<8x128xf32>
    %30 = tpu.matmul %26, %5, %cst_22 {dimension_numbers = #tpu.dot_dimension_numbers<[1], [0], [0], [1], [0, 0, 1, 1], [], []>} : vector<8x128xf32>, vector<128x128xf32>, vector<8x128xf32> -> vector<8x128xf32>
    %cst_23 = arith.constant 0.899999976 : f32
    %31 = vector.broadcast %cst_23 : f32 to vector<8x128xf32>
    %32 = arith.mulf %31, %24 : vector<8x128xf32>
    %33 = arith.addf %32, %30 : vector<8x128xf32>
    %c2 = arith.constant 2 : index
    %c0_24 = arith.constant 0 : index
    %c0_25 = arith.constant 0 : index
    %34 = vector.load %arg5[%c2, %c0_24, %c0_25] : memref<8x8x128xf32, #tpu.memory_space<vmem>>, vector<1x8x128xf32>
    %35 = vector.shape_cast %34 : vector<1x8x128xf32> to vector<8x128xf32>
    %36 = arith.addf %33, %35 : vector<8x128xf32>
    %cst_26 = arith.constant 0.000000e+00 : f32
    %37 = vector.broadcast %cst_26 : f32 to vector<8x128xf32>
    %38 = arith.maximumf %36, %37 : vector<8x128xf32>
    %c2_27 = arith.constant 2 : index
    %c0_28 = arith.constant 0 : index
    %c0_29 = arith.constant 0 : index
    %39 = vector.load %arg6[%c2_27, %c0_28, %c0_29] : memref<8x8x128xf32, #tpu.memory_space<vmem>>, vector<1x8x128xf32>
    %40 = vector.shape_cast %39 : vector<1x8x128xf32> to vector<8x128xf32>
    %41 = vector.shape_cast %38 : vector<8x128xf32> to vector<1x8x128xf32>
    tpu.vector_store %arg6[%c2_27, %c0_28, %c0_29], %41 {strides = array<i32>} : memref<8x8x128xf32, #tpu.memory_space<vmem>>, vector<1x8x128xf32>,
    %cst_30 = arith.constant dense<0.000000e+00> : vector<8x128xf32>
    %42 = tpu.matmul %38, %5, %cst_30 {dimension_numbers = #tpu.dot_dimension_numbers<[1], [0], [0], [1], [0, 0, 1, 1], [], []>} : vector<8x128xf32>, vector<128x128xf32>, vector<8x128xf32> -> vector<8x128xf32>
    %cst_31 = arith.constant 0.899999976 : f32
    %43 = vector.broadcast %cst_31 : f32 to vector<8x128xf32>
    %44 = arith.mulf %43, %36 : vector<8x128xf32>
    %45 = arith.addf %44, %42 : vector<8x128xf32>
    %c3 = arith.constant 3 : index
    %c0_32 = arith.constant 0 : index
    %c0_33 = arith.constant 0 : index
    %46 = vector.load %arg5[%c3, %c0_32, %c0_33] : memref<8x8x128xf32, #tpu.memory_space<vmem>>, vector<1x8x128xf32>
    %47 = vector.shape_cast %46 : vector<1x8x128xf32> to vector<8x128xf32>
    %48 = arith.addf %45, %47 : vector<8x128xf32>
    %cst_34 = arith.constant 0.000000e+00 : f32
    %49 = vector.broadcast %cst_34 : f32 to vector<8x128xf32>
    %50 = arith.maximumf %48, %49 : vector<8x128xf32>
    %c3_35 = arith.constant 3 : index
    %c0_36 = arith.constant 0 : index
    %c0_37 = arith.constant 0 : index
    %51 = vector.load %arg6[%c3_35, %c0_36, %c0_37] : memref<8x8x128xf32, #tpu.memory_space<vmem>>, vector<1x8x128xf32>
    %52 = vector.shape_cast %51 : vector<1x8x128xf32> to vector<8x128xf32>
    %53 = vector.shape_cast %50 : vector<8x128xf32> to vector<1x8x128xf32>
    tpu.vector_store %arg6[%c3_35, %c0_36, %c0_37], %53 {strides = array<i32>} : memref<8x8x128xf32, #tpu.memory_space<vmem>>, vector<1x8x128xf32>,
    %cst_38 = arith.constant dense<0.000000e+00> : vector<8x128xf32>
    %54 = tpu.matmul %50, %5, %cst_38 {dimension_numbers = #tpu.dot_dimension_numbers<[1], [0], [0], [1], [0, 0, 1, 1], [], []>} : vector<8x128xf32>, vector<128x128xf32>, vector<8x128xf32> -> vector<8x128xf32>
    %cst_39 = arith.constant 0.899999976 : f32
    %55 = vector.broadcast %cst_39 : f32 to vector<8x128xf32>
    %56 = arith.mulf %55, %48 : vector<8x128xf32>
    %57 = arith.addf %56, %54 : vector<8x128xf32>
    %c4 = arith.constant 4 : index
    %c0_40 = arith.constant 0 : index
    %c0_41 = arith.constant 0 : index
    %58 = vector.load %arg5[%c4, %c0_40, %c0_41] : memref<8x8x128xf32, #tpu.memory_space<vmem>>, vector<1x8x128xf32>
    %59 = vector.shape_cast %58 : vector<1x8x128xf32> to vector<8x128xf32>
    %60 = arith.addf %57, %59 : vector<8x128xf32>
    %cst_42 = arith.constant 0.000000e+00 : f32
    %61 = vector.broadcast %cst_42 : f32 to vector<8x128xf32>
    %62 = arith.maximumf %60, %61 : vector<8x128xf32>
    %c4_43 = arith.constant 4 : index
    %c0_44 = arith.constant 0 : index
    %c0_45 = arith.constant 0 : index
    %63 = vector.load %arg6[%c4_43, %c0_44, %c0_45] : memref<8x8x128xf32, #tpu.memory_space<vmem>>, vector<1x8x128xf32>
    %64 = vector.shape_cast %63 : vector<1x8x128xf32> to vector<8x128xf32>
    %65 = vector.shape_cast %62 : vector<8x128xf32> to vector<1x8x128xf32>
    tpu.vector_store %arg6[%c4_43, %c0_44, %c0_45], %65 {strides = array<i32>} : memref<8x8x128xf32, #tpu.memory_space<vmem>>, vector<1x8x128xf32>,
    %cst_46 = arith.constant dense<0.000000e+00> : vector<8x128xf32>
    %66 = tpu.matmul %62, %5, %cst_46 {dimension_numbers = #tpu.dot_dimension_numbers<[1], [0], [0], [1], [0, 0, 1, 1], [], []>} : vector<8x128xf32>, vector<128x128xf32>, vector<8x128xf32> -> vector<8x128xf32>
    %cst_47 = arith.constant 0.899999976 : f32
    %67 = vector.broadcast %cst_47 : f32 to vector<8x128xf32>
    %68 = arith.mulf %67, %60 : vector<8x128xf32>
    %69 = arith.addf %68, %66 : vector<8x128xf32>
    %c5 = arith.constant 5 : index
    %c0_48 = arith.constant 0 : index
    %c0_49 = arith.constant 0 : index
    %70 = vector.load %arg5[%c5, %c0_48, %c0_49] : memref<8x8x128xf32, #tpu.memory_space<vmem>>, vector<1x8x128xf32>
    %71 = vector.shape_cast %70 : vector<1x8x128xf32> to vector<8x128xf32>
    %72 = arith.addf %69, %71 : vector<8x128xf32>
    %cst_50 = arith.constant 0.000000e+00 : f32
    %73 = vector.broadcast %cst_50 : f32 to vector<8x128xf32>
    %74 = arith.maximumf %72, %73 : vector<8x128xf32>
    %c5_51 = arith.constant 5 : index
    %c0_52 = arith.constant 0 : index
    %c0_53 = arith.constant 0 : index
    %75 = vector.load %arg6[%c5_51, %c0_52, %c0_53] : memref<8x8x128xf32, #tpu.memory_space<vmem>>, vector<1x8x128xf32>
    %76 = vector.shape_cast %75 : vector<1x8x128xf32> to vector<8x128xf32>
    %77 = vector.shape_cast %74 : vector<8x128xf32> to vector<1x8x128xf32>
    tpu.vector_store %arg6[%c5_51, %c0_52, %c0_53], %77 {strides = array<i32>} : memref<8x8x128xf32, #tpu.memory_space<vmem>>, vector<1x8x128xf32>,
    %cst_54 = arith.constant dense<0.000000e+00> : vector<8x128xf32>
    %78 = tpu.matmul %74, %5, %cst_54 {dimension_numbers = #tpu.dot_dimension_numbers<[1], [0], [0], [1], [0, 0, 1, 1], [], []>} : vector<8x128xf32>, vector<128x128xf32>, vector<8x128xf32> -> vector<8x128xf32>
    %cst_55 = arith.constant 0.899999976 : f32
    %79 = vector.broadcast %cst_55 : f32 to vector<8x128xf32>
    %80 = arith.mulf %79, %72 : vector<8x128xf32>
    %81 = arith.addf %80, %78 : vector<8x128xf32>
    %c6 = arith.constant 6 : index
    %c0_56 = arith.constant 0 : index
    %c0_57 = arith.constant 0 : index
    %82 = vector.load %arg5[%c6, %c0_56, %c0_57] : memref<8x8x128xf32, #tpu.memory_space<vmem>>, vector<1x8x128xf32>
    %83 = vector.shape_cast %82 : vector<1x8x128xf32> to vector<8x128xf32>
    %84 = arith.addf %81, %83 : vector<8x128xf32>
    %cst_58 = arith.constant 0.000000e+00 : f32
    %85 = vector.broadcast %cst_58 : f32 to vector<8x128xf32>
    %86 = arith.maximumf %84, %85 : vector<8x128xf32>
    %c6_59 = arith.constant 6 : index
    %c0_60 = arith.constant 0 : index
    %c0_61 = arith.constant 0 : index
    %87 = vector.load %arg6[%c6_59, %c0_60, %c0_61] : memref<8x8x128xf32, #tpu.memory_space<vmem>>, vector<1x8x128xf32>
    %88 = vector.shape_cast %87 : vector<1x8x128xf32> to vector<8x128xf32>
    %89 = vector.shape_cast %86 : vector<8x128xf32> to vector<1x8x128xf32>
    tpu.vector_store %arg6[%c6_59, %c0_60, %c0_61], %89 {strides = array<i32>} : memref<8x8x128xf32, #tpu.memory_space<vmem>>, vector<1x8x128xf32>,
    %cst_62 = arith.constant dense<0.000000e+00> : vector<8x128xf32>
    %90 = tpu.matmul %86, %5, %cst_62 {dimension_numbers = #tpu.dot_dimension_numbers<[1], [0], [0], [1], [0, 0, 1, 1], [], []>} : vector<8x128xf32>, vector<128x128xf32>, vector<8x128xf32> -> vector<8x128xf32>
    %cst_63 = arith.constant 0.899999976 : f32
    %91 = vector.broadcast %cst_63 : f32 to vector<8x128xf32>
    %92 = arith.mulf %91, %84 : vector<8x128xf32>
    %93 = arith.addf %92, %90 : vector<8x128xf32>
    %c7 = arith.constant 7 : index
    %c0_64 = arith.constant 0 : index
    %c0_65 = arith.constant 0 : index
    %94 = vector.load %arg5[%c7, %c0_64, %c0_65] : memref<8x8x128xf32, #tpu.memory_space<vmem>>, vector<1x8x128xf32>
    %95 = vector.shape_cast %94 : vector<1x8x128xf32> to vector<8x128xf32>
    %96 = arith.addf %93, %95 : vector<8x128xf32>
    %cst_66 = arith.constant 0.000000e+00 : f32
    %97 = vector.broadcast %cst_66 : f32 to vector<8x128xf32>
    %98 = arith.maximumf %96, %97 : vector<8x128xf32>
    %c7_67 = arith.constant 7 : index
    %c0_68 = arith.constant 0 : index
    %c0_69 = arith.constant 0 : index
    %99 = vector.load %arg6[%c7_67, %c0_68, %c0_69] : memref<8x8x128xf32, #tpu.memory_space<vmem>>, vector<1x8x128xf32>
    %100 = vector.shape_cast %99 : vector<1x8x128xf32> to vector<8x128xf32>
    %101 = vector.shape_cast %98 : vector<8x128xf32> to vector<1x8x128xf32>
    tpu.vector_store %arg6[%c7_67, %c0_68, %c0_69], %101 {strides = array<i32>} : memref<8x8x128xf32, #tpu.memory_space<vmem>>, vector<1x8x128xf32>,
    %c0_70 = arith.constant 0 : index
    %c0_71 = arith.constant 0 : index
    %102 = vector.load %arg7[%c0_70, %c0_71] : memref<8x128xf32, #tpu.memory_space<vmem>>, vector<8x128xf32>
    tpu.vector_store %arg7[%c0_70, %c0_71], %96 {strides = array<i32>} : memref<8x128xf32, #tpu.memory_space<vmem>>, vector<8x128xf32>,
    %c0_72 = arith.constant 0 : index
    %c0_73 = arith.constant 0 : index
    %103 = vector.load %arg8[%c0_72, %c0_73] : memref<8x128xf32, #tpu.memory_space<vmem>>, vector<8x128xf32>
    tpu.vector_store %arg8[%c0_72, %c0_73], %98 {strides = array<i32>} : memref<8x128xf32, #tpu.memory_space<vmem>>, vector<8x128xf32>,
    return
  }
  func.func @transform_0(%arg0: i32, %arg1: i32) -> (i32, i32) {
    %c0_i32 = arith.constant 0 : i32
    %c0_i32_0 = arith.constant 0 : i32
    %c0_i32_1 = arith.constant 0 : i32
    return %c0_i32, %c0_i32_0 : i32, i32
  }
  func.func @transform_1(%arg0: i32, %arg1: i32) -> (i32, i32) {
    %c0_i32 = arith.constant 0 : i32
    %c0_i32_0 = arith.constant 0 : i32
    return %arg0, %c0_i32 : i32, i32
  }
  func.func @transform_2(%arg0: i32, %arg1: i32) -> (i32, i32) {
    %c0_i32 = arith.constant 0 : i32
    %c0_i32_0 = arith.constant 0 : i32
    return %arg0, %c0_i32 : i32, i32
  }
  func.func @transform_3(%arg0: i32, %arg1: i32) -> (i32, i32, i32) {
    %c0_i32 = arith.constant 0 : i32
    %c0_i32_0 = arith.constant 0 : i32
    return %arg1, %arg0, %c0_i32 : i32, i32, i32
  }
  func.func @transform_4(%arg0: i32, %arg1: i32) -> (i32, i32, i32) {
    %c0_i32 = arith.constant 0 : i32
    %c0_i32_0 = arith.constant 0 : i32
    return %arg1, %arg0, %c0_i32 : i32, i32, i32
  }
}

</mosaic_0001>

<bundles_post_ra>
// kernel: tpu_custom_call.1
= control target key start
LH: loop header
LB: loop body
LE: loop exit
PB: predicated region body
PF: predicated region fallthrough
CT: control target
= control target key end

     0   :  { %9 = vsyncpa [#allocation5], 0  ;;  %s1633_s0 = inlined_call_operand.hbm [shape: f32[128,128], index: 0, kind: input, shape index: {}]   ;;  %s1634_s1 = inlined_call_operand.hbm [shape: f32[8,128], index: 1, kind: input, shape index: {}]   ;;  %s1635_s2 = inlined_call_operand.hbm [shape: f32[8,128], index: 2, kind: input, shape index: {}]   ;;  %s1636_s3 = inlined_call_operand.hbm [shape: f32[8,8,128], index: 3, kind: input, shape index: {}]   ;;  %s1637_s4 = inlined_call_operand.hbm [shape: f32[8,8,128], index: 4, kind: output, shape index: {}]  }
   0x1   :  { %10 = vsyncpa [#allocation8], 0 }
   0x2   :  { %11 = vsyncpa [#allocation11], 0 }
   0x3   :  { %12 = vsyncpa [#allocation6], 0  ;;  %s1271_s15 = smov [#allocation7]   ;;  %s1272_s17 = smov [#allocation4]  }
   0x4   :  { %s31_s16 = sshll.u32 %s1271_s15, 4  ;;  %s18_s18 = sshll.u32 %s1272_s17, 4  ;;  %s32_s16 = int_to_ptr.vmem [resolvable:$true] %s31_s16  ;;  %s19_s18 = int_to_ptr.vmem [resolvable:$true] %s18_s18 }
   0x5   :  { %s1171_s19 = scalar_lea.vmem %s32_s16, 128  ;;  %p1176_p1 = scmp.lt.s32.totalorder %s32_s16, %s32_s16 }
   0x6   :  { %p1172_p0 = scmp.ne.s32.totalorder %s32_s16, %s1171_s19  ;;  %p1177_p2 = scmp.lt.s32.totalorder %s1171_s19, %s1171_s19 }
   0x8   :  { %p1178_p3 = por %p1177_p2, %p1176_p1 }
   0xa   :  { %p1179_p4 = pnand %p1178_p3, %p1172_p0 }
   0xc   :  { %1182 = shalt.err (!%p1179_p4)
}
   0xd   :  { %34 = dma.hbm_to_vmem [thread:$0]  %s1634_s1, 128, %s32_s16, [#allocation8]  }
   0xe   :  { %s1191_s22 = scalar_lea.vmem %s19_s18, 2048  ;;  %p1196_p6 = scmp.lt.s32.totalorder %s19_s18, %s19_s18 }
   0xf   :  { %p1192_p5 = scmp.ne.s32.totalorder %s19_s18, %s1191_s22  ;;  %p1197_p7 = scmp.lt.s32.totalorder %s1191_s22, %s1191_s22 }
  0x11   :  { %p1198_p8 = por %p1197_p7, %p1196_p6 }
  0x13   :  { %p1199_p9 = pnand %p1198_p8, %p1192_p5 }
  0x15   :  { %1202 = shalt.err (!%p1199_p9)
}
  0x16   :  { %s1273_s23 = smov 128   ;;  %s1274_s24 = smov 8  }
  0x17   :  { %24 = dma.hbm_to_vmem [thread:$0]  %s1633_s0, 2048, %s19_s18, [#allocation5], %s1273_s23, %s1273_s23, %s1274_s24  }
  0x18   :  { %s1275_s27 = smov [#allocation9]   ;;  %s1276_s29 = smov [#allocation10]  }
  0x19   :  { %s41_s28 = sshll.u32 %s1275_s27, 4  ;;  %s50_s1 = sshll.u32 %s1276_s29, 4  ;;  %s42_s28 = int_to_ptr.vmem [resolvable:$true] %s41_s28  ;;  %s51_s1 = int_to_ptr.vmem [resolvable:$true] %s50_s1 }
  0x1a   :  { %s1211_s30 = scalar_lea.vmem %s42_s28, 128  ;;  %p1216_p11 = scmp.lt.s32.totalorder %s42_s28, %s42_s28 }
  0x1b   :  { %p1212_p10 = scmp.ne.s32.totalorder %s42_s28, %s1211_s30  ;;  %p1217_p12 = scmp.lt.s32.totalorder %s1211_s30, %s1211_s30 }
  0x1d   :  { %p1218_p13 = por %p1217_p12, %p1216_p11 }
  0x1f   :  { %p1219_p0 = pnand %p1218_p13, %p1212_p10 }
  0x21   :  { %1222 = shalt.err (!%p1219_p0)
}
  0x22   :  { %44 = dma.hbm_to_vmem [thread:$0]  %s1635_s2, 128, %s42_s28, [#allocation8]  }
  0x23   :  { %s1231_s7 = scalar_lea.vmem %s51_s1, 1024  ;;  %p1236_p2 = scmp.lt.s32.totalorder %s51_s1, %s51_s1 }
  0x24   :  { %p1232_p1 = scmp.ne.s32.totalorder %s51_s1, %s1231_s7  ;;  %p1237_p3 = scmp.lt.s32.totalorder %s1231_s7, %s1231_s7 }
  0x26   :  { %p1238_p4 = por %p1237_p3, %p1236_p2 }
  0x28   :  { %p1239_p5 = pnand %p1238_p4, %p1232_p1 }
  0x2a   :  { %1242 = shalt.err (!%p1239_p5)
}
  0x2b   :  { %56 = dma.hbm_to_vmem [thread:$0]  %s1636_s3, 1024, %s51_s1, [#allocation11], %s1273_s23, %s1273_s23, %s1274_s24  }
  0x2c   :  { %1263 = dma.done.wait [#allocation5], 2048  }
  0x2d   :  { %1264 = vsyncadd [#allocation5], 4294965248 }
  0x2e   :  { %1265 = dma.done.wait [#allocation8], 256  }
  0x2f   :  { %1266 = vsyncadd [#allocation8], 4294967040 }
  0x30   :  { %1267 = dma.done.wait [#allocation11], 1024  }
  0x31   :  { %1268 = vsyncadd [#allocation11], 4294966272  ;;  %v1277_v0 = vmov 0.0   ;;  %vm1278_vm0 = vmmov 0   ;;  %v1329_v1 = vld [vmem:[#allocation4 + $0x78] sm:$0xff]  ;;  %v1331_v2 = vld [vmem:[#allocation4 + $0x70] sm:$0xff] }
  0x32   :  { %874 = vmatprep.subr.mxu0 %v1277_v0  ;;  %906 = vmatprep.mubr.msk.f32.mxu0 %vm1278_vm0, %v1277_v0  ;;  %v1336_v3 = vld [vmem:[#allocation4 + $0x68] sm:$0xff]  ;;  %v1342_v4 = vld [vmem:[#allocation4 + $0x60] sm:$0xff]  ;;  %v1348_v5 = vld [vmem:[#allocation4 + $0x58] sm:$0xff]  ;;  %s1279_s2 = smov [#allocation12]  }
  0x33   :  { %909 = vmatprep.subr.mxu1 %v1277_v0  ;;  %941 = vmatprep.mubr.msk.f32.mxu1 %vm1278_vm0, %v1277_v0  ;;  %v1354_v6 = vld [vmem:[#allocation4 + $0x50] sm:$0xff]  ;;  %v1360_v7 = vld [vmem:[#allocation4 + $0x48] sm:$0xff]  ;;  %v1366_v8 = vld [vmem:[#allocation4 + $0x40] sm:$0xff]  ;;  %s724_s3 = sshll.u32 %s1279_s2, 4  ;;  %s725_s3 = int_to_ptr.vmem [resolvable:$true] %s724_s3 }
  0x34   :  { %875 = vmatpush3.msra.mxu0 %v1329_v1  ;;  %910 = vmatpush3.msra.mxu1 %v1329_v1  ;;  %v1372_v9 = vld [vmem:[#allocation4 + $0x38] sm:$0xff]  ;;  %v1378_v10 = vld [vmem:[#allocation4 + $0x30] sm:$0xff]  ;;  %v1384_v11 = vld [vmem:[#allocation4 + $0x28] sm:$0xff]  ;;  %s1243_s9 = scalar_lea.vmem %s725_s3, 1024  ;;  %p1248_p7 = scmp.lt.s32.totalorder %s725_s3, %s725_s3 }
  0x35   :  { %876 = vmatprep.subr.mxu0 %v1277_v0  ;;  %911 = vmatprep.subr.mxu1 %v1277_v0  ;;  %v1390_v12 = vld [vmem:[#allocation4 + $0x20] sm:$0xff]  ;;  %v1396_v13 = vld [vmem:[#allocation4 + $0x18] sm:$0xff]  ;;  %v1402_v14 = vld [vmem:[#allocation4 + $0x10] sm:$0xff]  ;;  %p1244_p6 = scmp.ne.s32.totalorder %s725_s3, %s1243_s9  ;;  %p1249_p8 = scmp.lt.s32.totalorder %s1243_s9, %s1243_s9 }
  0x36   :  { %877 = vmatpush3.msra.mxu0 %v1331_v2  ;;  %912 = vmatpush3.msra.mxu1 %v1331_v2  ;;  %v1408_v15 = vld [vmem:[#allocation4 + $0x8] sm:$0xff]  ;;  %v1414_v16 = vld [vmem:[#allocation4] sm:$0xff]  ;;  %v167_v21 = vld [vmem:[#allocation10] sm:$0xff] }
  0x37   :  { %878 = vmatprep.subr.mxu0 %v1277_v0  ;;  %913 = vmatprep.subr.mxu1 %v1277_v0  ;;  %v75_v17 = vld [vmem:[#allocation7] sm:$0xff]  ;;  %v73_v18 = vld [vmem:[#allocation9] sm:$0xff]  ;;  %v244_v28 = vld [vmem:[#allocation10 + $0x8] sm:$0xff]  ;;  %p1250_p9 = por %p1249_p8, %p1248_p7 }
  0x38   :  { %879 = vmatpush3.msra.mxu0 %v1336_v3  ;;  %914 = vmatpush3.msra.mxu1 %v1336_v3  ;;  %v165_v19 = vmul.f32 0.9, %v73_v18  ;;  %v322_v35 = vld [vmem:[#allocation10 + $0x10] sm:$0xff]  ;;  %v400_v42 = vld [vmem:[#allocation10 + $0x18] sm:$0xff]  ;;  %v478_v49 = vld [vmem:[#allocation10 + $0x20] sm:$0xff] }
  0x39   :  { %880 = vmatprep.subr.mxu0 %v1277_v0  ;;  %915 = vmatprep.subr.mxu1 %v1277_v0  ;;  %v556_v56 = vld [vmem:[#allocation10 + $0x28] sm:$0xff]  ;;  %v634_v63 = vld [vmem:[#allocation10 + $0x30] sm:$0xff]  ;;  %p1251_p10 = pnand %p1250_p9, %p1244_p6 }
  0x3a   :  { %881 = vmatpush3.msra.mxu0 %v1342_v4  ;;  %916 = vmatpush3.msra.mxu1 %v1342_v4 }
  0x3b   :  { %882 = vmatprep.subr.mxu0 %v1277_v0  ;;  %917 = vmatprep.subr.mxu1 %v1277_v0 }
  0x3c   :  { %883 = vmatpush3.msra.mxu0 %v1348_v5  ;;  %918 = vmatpush3.msra.mxu1 %v1348_v5 }
  0x3d   :  { %884 = vmatprep.subr.mxu0 %v1277_v0  ;;  %919 = vmatprep.subr.mxu1 %v1277_v0 }
  0x3e   :  { %885 = vmatpush3.msra.mxu0 %v1354_v6  ;;  %920 = vmatpush3.msra.mxu1 %v1354_v6 }
  0x3f   :  { %886 = vmatprep.subr.mxu0 %v1277_v0  ;;  %921 = vmatprep.subr.mxu1 %v1277_v0 }
  0x40   :  { %887 = vmatpush3.msra.mxu0 %v1360_v7  ;;  %922 = vmatpush3.msra.mxu1 %v1360_v7 }
  0x41   :  { %888 = vmatprep.subr.mxu0 %v1277_v0  ;;  %923 = vmatprep.subr.mxu1 %v1277_v0 }
  0x42   :  { %889 = vmatpush3.msra.mxu0 %v1366_v8  ;;  %924 = vmatpush3.msra.mxu1 %v1366_v8 }
  0x43   :  { %890 = vmatprep.subr.mxu0 %v1277_v0  ;;  %925 = vmatprep.subr.mxu1 %v1277_v0 }
  0x44   :  { %891 = vmatpush3.msra.mxu0 %v1372_v9  ;;  %926 = vmatpush3.msra.mxu1 %v1372_v9 }
  0x45   :  { %892 = vmatprep.subr.mxu0 %v1277_v0  ;;  %927 = vmatprep.subr.mxu1 %v1277_v0 }
  0x46   :  { %893 = vmatpush3.msra.mxu0 %v1378_v10  ;;  %928 = vmatpush3.msra.mxu1 %v1378_v10 }
  0x47   :  { %894 = vmatprep.subr.mxu0 %v1277_v0  ;;  %929 = vmatprep.subr.mxu1 %v1277_v0 }
  0x48   :  { %895 = vmatpush3.msra.mxu0 %v1384_v11  ;;  %930 = vmatpush3.msra.mxu1 %v1384_v11 }
  0x49   :  { %896 = vmatprep.subr.mxu0 %v1277_v0  ;;  %931 = vmatprep.subr.mxu1 %v1277_v0 }
  0x4a   :  { %897 = vmatpush3.msra.mxu0 %v1390_v12  ;;  %932 = vmatpush3.msra.mxu1 %v1390_v12 }
  0x4b   :  { %898 = vmatprep.subr.mxu0 %v1277_v0  ;;  %933 = vmatprep.subr.mxu1 %v1277_v0 }
  0x4c   :  { %899 = vmatpush3.msra.mxu0 %v1396_v13  ;;  %934 = vmatpush3.msra.mxu1 %v1396_v13 }
  0x4d   :  { %900 = vmatprep.subr.mxu0 %v1277_v0  ;;  %935 = vmatprep.subr.mxu1 %v1277_v0 }
  0x4e   :  { %901 = vmatpush3.msra.mxu0 %v1402_v14  ;;  %936 = vmatpush3.msra.mxu1 %v1402_v14 }
  0x4f   :  { %902 = vmatprep.subr.mxu0 %v1277_v0  ;;  %937 = vmatprep.subr.mxu1 %v1277_v0 }
  0x50   :  { %903 = vmatpush3.msra.mxu0 %v1408_v15  ;;  %938 = vmatpush3.msra.mxu1 %v1408_v15 }
  0x51   :  { %904 = vmatprep.subr.mxu0 %v1277_v0  ;;  %939 = vmatprep.subr.mxu1 %v1277_v0 }
  0x52   :  { %905 = vmatpush3.msra.mxu0 %v1414_v16  ;;  %940 = vmatpush3.msra.mxu1 %v1414_v16 }
  0x53   :  { %907 = vmatmul.mubr.f32.vlgmr.msra.gmra.mxu0 %v75_v17  ;;  %944 = vmatprep.subr.mxu0 %v1277_v0 }
  0x54   :  { %945 = vmatpush3.msra.mxu0 %v1329_v1  ;;  %976 = vmatprep.mubr.msk.f32.mxu0 %vm1278_vm0, %v1277_v0 }
  0x55   :  { %946 = vmatprep.subr.mxu0 %v1277_v0  ;;  %979 = vmatprep.subr.mxu1 %v1277_v0 }
  0x56   :  { %947 = vmatpush3.msra.mxu0 %v1331_v2 }
  0x57   :  { %948 = vmatprep.subr.mxu0 %v1277_v0 }
  0x58   :  { %949 = vmatpush3.msra.mxu0 %v1336_v3 }
  0x59   :  { %950 = vmatprep.subr.mxu0 %v1277_v0 }
  0x5a   :  { %951 = vmatpush3.msra.mxu0 %v1342_v4 }
  0x5b   :  { %952 = vmatprep.subr.mxu0 %v1277_v0 }
  0x5c   :  { %953 = vmatpush3.msra.mxu0 %v1348_v5 }
  0x5d   :  { %954 = vmatprep.subr.mxu0 %v1277_v0 }
  0x5e   :  { %955 = vmatpush3.msra.mxu0 %v1354_v6 }
  0x5f   :  { %956 = vmatprep.subr.mxu0 %v1277_v0 }
  0x60   :  { %957 = vmatpush3.msra.mxu0 %v1360_v7 }
  0x61   :  { %958 = vmatprep.subr.mxu0 %v1277_v0 }
  0x62   :  { %959 = vmatpush3.msra.mxu0 %v1366_v8 }
  0x63   :  { %960 = vmatprep.subr.mxu0 %v1277_v0 }
  0x64   :  { %961 = vmatpush3.msra.mxu0 %v1372_v9 }
  0x65   :  { %962 = vmatprep.subr.mxu0 %v1277_v0 }
  0x66   :  { %963 = vmatpush3.msra.mxu0 %v1378_v10 }
  0x67   :  { %964 = vmatprep.subr.mxu0 %v1277_v0 }
  0x68   :  { %965 = vmatpush3.msra.mxu0 %v1384_v11 }
  0x69   :  { %966 = vmatprep.subr.mxu0 %v1277_v0 }
  0x6a   :  { %967 = vmatpush3.msra.mxu0 %v1390_v12 }
  0x6b   :  { %968 = vmatprep.subr.mxu0 %v1277_v0 }
  0x6c   :  { %969 = vmatpush3.msra.mxu0 %v1396_v13 }
  0x6d   :  { %970 = vmatprep.subr.mxu0 %v1277_v0 }
  0x6e   :  { %971 = vmatpush3.msra.mxu0 %v1402_v14 }
  0x6f   :  { %972 = vmatprep.subr.mxu0 %v1277_v0 }
  0x70   :  { %973 = vmatpush3.msra.mxu0 %v1408_v15 }
  0x71   :  { %974 = vmatprep.subr.mxu0 %v1277_v0 }
  0x72   :  { %975 = vmatpush3.msra.mxu0 %v1414_v16 }
  0x73   :  { %1014 = vmatprep.subr.mxu0 %v1277_v0 }
 0x113   :  { %v161_v20 = vpop.f32.mrf.mxu0 }
 0x114   :  { %v166_v22 = vadd.f32 %v165_v19, %v161_v20 }
 0x115   :  { %v908_v23 = vpop.f32.mrf.mxu0 }
 0x116   :  { %v168_v24 = vadd.f32 %v167_v21, %v166_v22 }
 0x118   :  { %v169_v25 = vmax.f32 %v168_v24, 0.0  ;;  %v241_v26 = vmul.f32 0.9, %v168_v24 }
 0x11a   :  { %170 = vst [vmem:[#allocation12] sm:$0xff] %v169_v25  ;;  %942 = vmatmul.mubr.f32.vlgmr.msra.gmra.mxu1 %v169_v25 }
 0x11b   :  { %980 = vmatpush3.msra.mxu1 %v1329_v1  ;;  %1011 = vmatprep.mubr.msk.f32.mxu1 %vm1278_vm0, %v1277_v0 }
 0x11c   :  { %981 = vmatprep.subr.mxu1 %v1277_v0 }
 0x11d   :  { %982 = vmatpush3.msra.mxu1 %v1331_v2 }
 0x11e   :  { %983 = vmatprep.subr.mxu1 %v1277_v0 }
 0x11f   :  { %984 = vmatpush3.msra.mxu1 %v1336_v3 }
 0x120   :  { %985 = vmatprep.subr.mxu1 %v1277_v0 }
 0x121   :  { %986 = vmatpush3.msra.mxu1 %v1342_v4 }
 0x122   :  { %987 = vmatprep.subr.mxu1 %v1277_v0 }
 0x123   :  { %988 = vmatpush3.msra.mxu1 %v1348_v5 }
 0x124   :  { %989 = vmatprep.subr.mxu1 %v1277_v0 }
 0x125   :  { %990 = vmatpush3.msra.mxu1 %v1354_v6 }
 0x126   :  { %991 = vmatprep.subr.mxu1 %v1277_v0 }
 0x127   :  { %992 = vmatpush3.msra.mxu1 %v1360_v7 }
 0x128   :  { %993 = vmatprep.subr.mxu1 %v1277_v0 }
 0x129   :  { %994 = vmatpush3.msra.mxu1 %v1366_v8 }
 0x12a   :  { %995 = vmatprep.subr.mxu1 %v1277_v0 }
 0x12b   :  { %996 = vmatpush3.msra.mxu1 %v1372_v9 }
 0x12c   :  { %997 = vmatprep.subr.mxu1 %v1277_v0 }
 0x12d   :  { %998 = vmatpush3.msra.mxu1 %v1378_v10 }
 0x12e   :  { %999 = vmatprep.subr.mxu1 %v1277_v0 }
 0x12f   :  { %1000 = vmatpush3.msra.mxu1 %v1384_v11 }
 0x130   :  { %1001 = vmatprep.subr.mxu1 %v1277_v0 }
 0x131   :  { %1002 = vmatpush3.msra.mxu1 %v1390_v12 }
 0x132   :  { %1003 = vmatprep.subr.mxu1 %v1277_v0 }
 0x133   :  { %1004 = vmatpush3.msra.mxu1 %v1396_v13 }
 0x134   :  { %1005 = vmatprep.subr.mxu1 %v1277_v0 }
 0x135   :  { %1006 = vmatpush3.msra.mxu1 %v1402_v14 }
 0x136   :  { %1007 = vmatprep.subr.mxu1 %v1277_v0 }
 0x137   :  { %1008 = vmatpush3.msra.mxu1 %v1408_v15 }
 0x138   :  { %1009 = vmatprep.subr.mxu1 %v1277_v0 }
 0x139   :  { %1010 = vmatpush3.msra.mxu1 %v1414_v16 }
 0x13a   :  { %1049 = vmatprep.subr.mxu1 %v1277_v0 }
 0x1da   :  { %v237_v27 = vpop.f32.mrf.mxu1 }
 0x1db   :  { %v242_v29 = vadd.f32 %v241_v26, %v237_v27 }
 0x1dc   :  { %v943_v30 = vpop.f32.mrf.mxu1 }
 0x1dd   :  { %v245_v31 = vadd.f32 %v244_v28, %v242_v29 }
 0x1df   :  { %v246_v32 = vmax.f32 %v245_v31, 0.0  ;;  %v319_v33 = vmul.f32 0.9, %v245_v31 }
 0x1e1   :  { %248 = vst [vmem:[#allocation12 + $0x8] sm:$0xff] %v246_v32  ;;  %977 = vmatmul.mubr.f32.vlgmr.msra.gmra.mxu0 %v246_v32 }
 0x1e2   :  { %1015 = vmatpush3.msra.mxu0 %v1329_v1  ;;  %1046 = vmatprep.mubr.msk.f32.mxu0 %vm1278_vm0, %v1277_v0 }
 0x1e3   :  { %1016 = vmatprep.subr.mxu0 %v1277_v0 }
 0x1e4   :  { %1017 = vmatpush3.msra.mxu0 %v1331_v2 }
 0x1e5   :  { %1018 = vmatprep.subr.mxu0 %v1277_v0 }
 0x1e6   :  { %1019 = vmatpush3.msra.mxu0 %v1336_v3 }
 0x1e7   :  { %1020 = vmatprep.subr.mxu0 %v1277_v0 }
 0x1e8   :  { %1021 = vmatpush3.msra.mxu0 %v1342_v4 }
 0x1e9   :  { %1022 = vmatprep.subr.mxu0 %v1277_v0 }
 0x1ea   :  { %1023 = vmatpush3.msra.mxu0 %v1348_v5 }
 0x1eb   :  { %1024 = vmatprep.subr.mxu0 %v1277_v0 }
 0x1ec   :  { %1025 = vmatpush3.msra.mxu0 %v1354_v6 }
 0x1ed   :  { %1026 = vmatprep.subr.mxu0 %v1277_v0 }
 0x1ee   :  { %1027 = vmatpush3.msra.mxu0 %v1360_v7 }
 0x1ef   :  { %1028 = vmatprep.subr.mxu0 %v1277_v0 }
 0x1f0   :  { %1029 = vmatpush3.msra.mxu0 %v1366_v8 }
 0x1f1   :  { %1030 = vmatprep.subr.mxu0 %v1277_v0 }
 0x1f2   :  { %1031 = vmatpush3.msra.mxu0 %v1372_v9 }
 0x1f3   :  { %1032 = vmatprep.subr.mxu0 %v1277_v0 }
 0x1f4   :  { %1033 = vmatpush3.msra.mxu0 %v1378_v10 }
 0x1f5   :  { %1034 = vmatprep.subr.mxu0 %v1277_v0 }
 0x1f6   :  { %1035 = vmatpush3.msra.mxu0 %v1384_v11 }
 0x1f7   :  { %1036 = vmatprep.subr.mxu0 %v1277_v0 }
 0x1f8   :  { %1037 = vmatpush3.msra.mxu0 %v1390_v12 }
 0x1f9   :  { %1038 = vmatprep.subr.mxu0 %v1277_v0 }
 0x1fa   :  { %1039 = vmatpush3.msra.mxu0 %v1396_v13 }
 0x1fb   :  { %1040 = vmatprep.subr.mxu0 %v1277_v0 }
 0x1fc   :  { %1041 = vmatpush3.msra.mxu0 %v1402_v14 }
 0x1fd   :  { %1042 = vmatprep.subr.mxu0 %v1277_v0 }
 0x1fe   :  { %1043 = vmatpush3.msra.mxu0 %v1408_v15 }
 0x1ff   :  { %1044 = vmatprep.subr.mxu0 %v1277_v0 }
 0x200   :  { %1045 = vmatpush3.msra.mxu0 %v1414_v16 }
 0x201   :  { %1084 = vmatprep.subr.mxu0 %v1277_v0 }
 0x2a1   :  { %v315_v34 = vpop.f32.mrf.mxu0 }
 0x2a2   :  { %v320_v36 = vadd.f32 %v319_v33, %v315_v34 }
 0x2a3   :  { %v978_v37 = vpop.f32.mrf.mxu0 }
 0x2a4   :  { %v323_v38 = vadd.f32 %v322_v35, %v320_v36 }
 0x2a6   :  { %v324_v39 = vmax.f32 %v323_v38, 0.0  ;;  %v397_v40 = vmul.f32 0.9, %v323_v38 }
 0x2a8   :  { %326 = vst [vmem:[#allocation12 + $0x10] sm:$0xff] %v324_v39  ;;  %1012 = vmatmul.mubr.f32.vlgmr.msra.gmra.mxu1 %v324_v39 }
 0x2a9   :  { %1050 = vmatpush3.msra.mxu1 %v1329_v1  ;;  %1081 = vmatprep.mubr.msk.f32.mxu1 %vm1278_vm0, %v1277_v0 }
 0x2aa   :  { %1051 = vmatprep.subr.mxu1 %v1277_v0 }
 0x2ab   :  { %1052 = vmatpush3.msra.mxu1 %v1331_v2 }
 0x2ac   :  { %1053 = vmatprep.subr.mxu1 %v1277_v0 }
 0x2ad   :  { %1054 = vmatpush3.msra.mxu1 %v1336_v3 }
 0x2ae   :  { %1055 = vmatprep.subr.mxu1 %v1277_v0 }
 0x2af   :  { %1056 = vmatpush3.msra.mxu1 %v1342_v4 }
 0x2b0   :  { %1057 = vmatprep.subr.mxu1 %v1277_v0 }
 0x2b1   :  { %1058 = vmatpush3.msra.mxu1 %v1348_v5 }
 0x2b2   :  { %1059 = vmatprep.subr.mxu1 %v1277_v0 }
 0x2b3   :  { %1060 = vmatpush3.msra.mxu1 %v1354_v6 }
 0x2b4   :  { %1061 = vmatprep.subr.mxu1 %v1277_v0 }
 0x2b5   :  { %1062 = vmatpush3.msra.mxu1 %v1360_v7 }
 0x2b6   :  { %1063 = vmatprep.subr.mxu1 %v1277_v0 }
 0x2b7   :  { %1064 = vmatpush3.msra.mxu1 %v1366_v8 }
 0x2b8   :  { %1065 = vmatprep.subr.mxu1 %v1277_v0 }
 0x2b9   :  { %1066 = vmatpush3.msra.mxu1 %v1372_v9 }
 0x2ba   :  { %1067 = vmatprep.subr.mxu1 %v1277_v0 }
 0x2bb   :  { %1068 = vmatpush3.msra.mxu1 %v1378_v10 }
 0x2bc   :  { %1069 = vmatprep.subr.mxu1 %v1277_v0 }
 0x2bd   :  { %1070 = vmatpush3.msra.mxu1 %v1384_v11 }
 0x2be   :  { %1071 = vmatprep.subr.mxu1 %v1277_v0 }
 0x2bf   :  { %1072 = vmatpush3.msra.mxu1 %v1390_v12 }
 0x2c0   :  { %1073 = vmatprep.subr.mxu1 %v1277_v0 }
 0x2c1   :  { %1074 = vmatpush3.msra.mxu1 %v1396_v13 }
 0x2c2   :  { %1075 = vmatprep.subr.mxu1 %v1277_v0 }
 0x2c3   :  { %1076 = vmatpush3.msra.mxu1 %v1402_v14 }
 0x2c4   :  { %1077 = vmatprep.subr.mxu1 %v1277_v0 }
 0x2c5   :  { %1078 = vmatpush3.msra.mxu1 %v1408_v15 }
 0x2c6   :  { %1079 = vmatprep.subr.mxu1 %v1277_v0 }
 0x2c7   :  { %1080 = vmatpush3.msra.mxu1 %v1414_v16 }
 0x2c8   :  { %1119 = vmatprep.subr.mxu1 %v1277_v0 }
 0x368   :  { %v393_v41 = vpop.f32.mrf.mxu1 }
 0x369   :  { %v398_v43 = vadd.f32 %v397_v40, %v393_v41 }
 0x36a   :  { %v1013_v44 = vpop.f32.mrf.mxu1 }
 0x36b   :  { %v401_v45 = vadd.f32 %v400_v42, %v398_v43 }
 0x36d   :  { %v402_v46 = vmax.f32 %v401_v45, 0.0  ;;  %v475_v47 = vmul.f32 0.9, %v401_v45 }
 0x36f   :  { %404 = vst [vmem:[#allocation12 + $0x18] sm:$0xff] %v402_v46  ;;  %1047 = vmatmul.mubr.f32.vlgmr.msra.gmra.mxu0 %v402_v46 }
 0x370   :  { %1085 = vmatpush3.msra.mxu0 %v1329_v1  ;;  %1116 = vmatprep.mubr.msk.f32.mxu0 %vm1278_vm0, %v1277_v0 }
 0x371   :  { %1086 = vmatprep.subr.mxu0 %v1277_v0 }
 0x372   :  { %1087 = vmatpush3.msra.mxu0 %v1331_v2 }
 0x373   :  { %1088 = vmatprep.subr.mxu0 %v1277_v0 }
 0x374   :  { %1089 = vmatpush3.msra.mxu0 %v1336_v3 }
 0x375   :  { %1090 = vmatprep.subr.mxu0 %v1277_v0 }
 0x376   :  { %1091 = vmatpush3.msra.mxu0 %v1342_v4 }
 0x377   :  { %1092 = vmatprep.subr.mxu0 %v1277_v0 }
 0x378   :  { %1093 = vmatpush3.msra.mxu0 %v1348_v5 }
 0x379   :  { %1094 = vmatprep.subr.mxu0 %v1277_v0 }
 0x37a   :  { %1095 = vmatpush3.msra.mxu0 %v1354_v6 }
 0x37b   :  { %1096 = vmatprep.subr.mxu0 %v1277_v0 }
 0x37c   :  { %1097 = vmatpush3.msra.mxu0 %v1360_v7 }
 0x37d   :  { %1098 = vmatprep.subr.mxu0 %v1277_v0 }
 0x37e   :  { %1099 = vmatpush3.msra.mxu0 %v1366_v8 }
 0x37f   :  { %1100 = vmatprep.subr.mxu0 %v1277_v0 }
 0x380   :  { %1101 = vmatpush3.msra.mxu0 %v1372_v9 }
 0x381   :  { %1102 = vmatprep.subr.mxu0 %v1277_v0 }
 0x382   :  { %1103 = vmatpush3.msra.mxu0 %v1378_v10 }
 0x383   :  { %1104 = vmatprep.subr.mxu0 %v1277_v0 }
 0x384   :  { %1105 = vmatpush3.msra.mxu0 %v1384_v11 }
 0x385   :  { %1106 = vmatprep.subr.mxu0 %v1277_v0 }
 0x386   :  { %1107 = vmatpush3.msra.mxu0 %v1390_v12 }
 0x387   :  { %1108 = vmatprep.subr.mxu0 %v1277_v0 }
 0x388   :  { %1109 = vmatpush3.msra.mxu0 %v1396_v13 }
 0x389   :  { %1110 = vmatprep.subr.mxu0 %v1277_v0 }
 0x38a   :  { %1111 = vmatpush3.msra.mxu0 %v1402_v14 }
 0x38b   :  { %1112 = vmatprep.subr.mxu0 %v1277_v0 }
 0x38c   :  { %1113 = vmatpush3.msra.mxu0 %v1408_v15 }
 0x38d   :  { %1114 = vmatprep.subr.mxu0 %v1277_v0 }
 0x38e   :  { %1115 = vmatpush3.msra.mxu0 %v1414_v16 }
 0x42f   :  { %v471_v48 = vpop.f32.mrf.mxu0 }
 0x430   :  { %v476_v50 = vadd.f32 %v475_v47, %v471_v48 }
 0x431   :  { %v1048_v51 = vpop.f32.mrf.mxu0 }
 0x432   :  { %v479_v52 = vadd.f32 %v478_v49, %v476_v50 }
 0x434   :  { %v480_v53 = vmax.f32 %v479_v52, 0.0  ;;  %v553_v54 = vmul.f32 0.9, %v479_v52 }
 0x436   :  { %482 = vst [vmem:[#allocation12 + $0x20] sm:$0xff] %v480_v53  ;;  %1082 = vmatmul.mubr.f32.vlgmr.msra.gmra.mxu1 %v480_v53 }
 0x437   :  { %1120 = vmatpush3.msra.mxu1 %v1329_v1  ;;  %1151 = vmatprep.mubr.msk.f32.mxu1 %vm1278_vm0, %v1277_v0 }
 0x438   :  { %1121 = vmatprep.subr.mxu1 %v1277_v0 }
 0x439   :  { %1122 = vmatpush3.msra.mxu1 %v1331_v2 }
 0x43a   :  { %1123 = vmatprep.subr.mxu1 %v1277_v0 }
 0x43b   :  { %1124 = vmatpush3.msra.mxu1 %v1336_v3 }
 0x43c   :  { %1125 = vmatprep.subr.mxu1 %v1277_v0 }
 0x43d   :  { %1126 = vmatpush3.msra.mxu1 %v1342_v4 }
 0x43e   :  { %1127 = vmatprep.subr.mxu1 %v1277_v0 }
 0x43f   :  { %1128 = vmatpush3.msra.mxu1 %v1348_v5 }
 0x440   :  { %1129 = vmatprep.subr.mxu1 %v1277_v0 }
 0x441   :  { %1130 = vmatpush3.msra.mxu1 %v1354_v6  ;;  %v712_v6 = vld [vmem:[#allocation10 + $0x38] sm:$0xff] }
 0x442   :  { %1131 = vmatprep.subr.mxu1 %v1277_v0 }
 0x443   :  { %1132 = vmatpush3.msra.mxu1 %v1360_v7 }
 0x444   :  { %1133 = vmatprep.subr.mxu1 %v1277_v0 }
 0x445   :  { %1134 = vmatpush3.msra.mxu1 %v1366_v8 }
 0x446   :  { %1135 = vmatprep.subr.mxu1 %v1277_v0 }
 0x447   :  { %1136 = vmatpush3.msra.mxu1 %v1372_v9 }
 0x448   :  { %1137 = vmatprep.subr.mxu1 %v1277_v0 }
 0x449   :  { %1138 = vmatpush3.msra.mxu1 %v1378_v10 }
 0x44a   :  { %1139 = vmatprep.subr.mxu1 %v1277_v0 }
 0x44b   :  { %1140 = vmatpush3.msra.mxu1 %v1384_v11 }
 0x44c   :  { %1141 = vmatprep.subr.mxu1 %v1277_v0 }
 0x44d   :  { %1142 = vmatpush3.msra.mxu1 %v1390_v12 }
 0x44e   :  { %1143 = vmatprep.subr.mxu1 %v1277_v0 }
 0x44f   :  { %1144 = vmatpush3.msra.mxu1 %v1396_v13 }
 0x450   :  { %1145 = vmatprep.subr.mxu1 %v1277_v0 }
 0x451   :  { %1146 = vmatpush3.msra.mxu1 %v1402_v14 }
 0x452   :  { %1147 = vmatprep.subr.mxu1 %v1277_v0 }
 0x453   :  { %1148 = vmatpush3.msra.mxu1 %v1408_v15 }
 0x454   :  { %1149 = vmatprep.subr.mxu1 %v1277_v0 }
 0x455   :  { %1150 = vmatpush3.msra.mxu1 %v1414_v16 }
 0x4f6   :  { %v549_v55 = vpop.f32.mrf.mxu1 }
 0x4f7   :  { %v554_v57 = vadd.f32 %v553_v54, %v549_v55 }
 0x4f8   :  { %v1083_v58 = vpop.f32.mrf.mxu1 }
 0x4f9   :  { %v557_v59 = vadd.f32 %v556_v56, %v554_v57 }
 0x4fb   :  { %v558_v60 = vmax.f32 %v557_v59, 0.0  ;;  %v631_v61 = vmul.f32 0.9, %v557_v59 }
 0x4fd   :  { %560 = vst [vmem:[#allocation12 + $0x28] sm:$0xff] %v558_v60  ;;  %1117 = vmatmul.mubr.f32.vlgmr.msra.gmra.mxu0 %v558_v60 }
 0x5bd   :  { %v627_v62 = vpop.f32.mrf.mxu0 }
 0x5be   :  { %v632_v1 = vadd.f32 %v631_v61, %v627_v62 }
 0x5bf   :  { %v1118_v2 = vpop.f32.mrf.mxu0 }
 0x5c0   :  { %v635_v3 = vadd.f32 %v634_v63, %v632_v1 }
 0x5c2   :  { %v636_v4 = vmax.f32 %v635_v3, 0.0  ;;  %v709_v0 = vmul.f32 0.9, %v635_v3 }
 0x5c4   :  { %638 = vst [vmem:[#allocation12 + $0x30] sm:$0xff] %v636_v4  ;;  %1152 = vmatmul.mubr.f32.vlgmr.msra.gmra.mxu1 %v636_v4 }
 0x684   :  { %v705_v5 = vpop.f32.mrf.mxu1 }
 0x685   :  { %v710_v7 = vadd.f32 %v709_v0, %v705_v5 }
 0x686   :  { %v1153_v8 = vpop.f32.mrf.mxu1 }
 0x687   :  { %v713_v9 = vadd.f32 %v712_v6, %v710_v7 }
 0x689   :  { %v714_v10 = vmax.f32 %v713_v9, 0.0 }
 0x68b   :  { %716 = vst [vmem:[#allocation12 + $0x38] sm:$0xff] %v714_v10 }
 0x68c   :  { %1254 = shalt.err (!%p1251_p10)
}
 0x68d   :  { %730 = dma.vmem_to_hbm [thread:$0]  %s725_s3, 1024, %s1637_s4, [#allocation6], %s1273_s23, %s1273_s23, %s1274_s24  }
 0x68e   :  { %1269 = dma.done.wait [#allocation6], 1024  }
 0x68f   :  { %1270 = vsyncadd [#allocation6], 4294966272 }
 0x690   :  { %734 = vsyncpa [#allocation5], 1 }
 0x691   :  { %735 = vsyncpa [#allocation8], 1 }
 0x692   :  { %736 = vsyncpa [#allocation11], 1 }
 0x693   :  { %737 = vsyncpa [#allocation6], 1 }

</bundles_post_ra>
